<compile_context>
chip_gen: v5e
topology: v5e:2x2
jax: 0.10.0
libtpu: 0.0.40
codegen_flags: <defaults>
</compile_context>

<pallas_src>
import jax
import jax.numpy as jnp
from jax.experimental import pallas as pl
from jax.experimental.pallas import tpu as pltpu


def _round_up(x, m):
    return ((x + m - 1) // m) * m


def _pick_tiles(n, max_rows, max_cols):
    """Pick (row_tile, k_tile, padded_n).

    K tile (adjacency last dim) must be a multiple of 128 or equal the padded
    extent; row tile must be a multiple of 8 or equal the padded extent.
    Prefers tiles that divide round_up(n, 8) so no adjacency padding copy is
    needed.
    """
    n8 = _round_up(n, 8)

    # --- K tile.
    if n8 <= max_cols:
        t_k, n_pad = n8, n8
    else:
        t_k = 0
        d = (max_cols // 128) * 128
        while d >= 128:
            if n8 % d == 0:
                t_k = d
                break
            d -= 128
        if t_k:
            n_pad = n8
        else:
            # TODO(synk): ragged last K tile (pl.BoundedSlice / in-kernel mask)
            # would avoid this tile-multiple pad copy of adj.
            t_k = max_cols
            n_pad = _round_up(n8, t_k)

    # --- row tile.
    if n_pad <= max_rows:
        t_m = n_pad
    else:
        t_m = 8
        d = (max_rows // 8) * 8
        while d >= 8:
            if n_pad % d == 0:
                t_m = d
                break
            d -= 8
    return t_m, t_k, n_pad


def _make_gcn_kernel(f_out):
    """Fused GCN kernel; `f_out` is the lane index that carries the denom."""

    def kernel(adj_ref, text_ref, w_ref, b_ref, out_ref, acc_ref):
        # adj_ref : (t_m, t_k)     text_ref: (t_k, F_in)
        # w_ref   : (F_in, f_pad)  b_ref   : (1, f_pad)
        # out_ref : (t_m, f_pad)   acc_ref : VMEM f32 (t_m, f_pad), carried
        #                          across the innermost (reduction) grid axis.
        k = pl.program_id(2)

        @pl.when(k == 0)
        def _init():
            acc_ref[...] = jnp.zeros_like(acc_ref)

        # Hidden tile for this K block of nodes, f32 accumulation on the MXU.
        hid = jnp.dot(text_ref[...], w_ref[...],
                      preferred_element_type=jnp.float32)
        # Fold the denominator row-sum into the MXU: lane `f_out` of hidden is
        # a column of ones, so acc[:, f_out] accumulates adj.sum(axis=-1) in a
        # pad lane that was wasted anyway.
        lane = jax.lax.broadcasted_iota(jnp.int32, hid.shape, 1)
        hid = jnp.where(lane == f_out, 1.0, hid)

        acc_ref[...] += jnp.dot(adj_ref[...], hid.astype(adj_ref.dtype),
                                preferred_element_type=jnp.float32)

        @pl.when(k == pl.num_programs(2) - 1)
        def _finalize():
            acc = acc_ref[...]
            lane_o = jax.lax.broadcasted_iota(jnp.int32, acc.shape, 1)
            # Extract the folded row-sum lane; exact division (runs once per
            # output tile, off the per-K critical path).
            denom = jnp.sum(jnp.where(lane_o == f_out, acc, 0.0),
                            axis=1, keepdims=True) + 1.0
            out_ref[...] = (acc / denom + b_ref[...]).astype(out_ref.dtype)

    return kernel


def graph_convolution(text, adj, weight, bias=None, *,
                      max_row_tile=512, max_col_tile=1024,
                      core_parallel_batch=False, adj_buffer_count=2):
    """out = (adj @ (text @ weight)) / (adj.sum(-1, keepdims=True) + 1) + bias.

    text: (B, N, F_in)   adj: (B, N, N)   weight: (F_in, F_out)   bias: (F_out,)
    Inputs may be f32 or bf16 (bf16 halves the dominant adj HBM stream);
    accumulation is always f32.
    """
    B, N, f_in = text.shape
    f_out = weight.shape[1]
    out_dtype = text.dtype

    # Lane-dense output with at least one spare lane for the folded denom.
    f_pad = _round_up(f_out + 1, 128)

    t_m, t_k, n_pad = _pick_tiles(N, max_row_tile, max_col_tile)

    if n_pad != N:
        # Zero padding is semantically neutral: padded adj rows/cols contribute
        # nothing, padded denom rows become 1, padded rows are sliced off.
        adj_p = jnp.pad(adj, ((0, 0), (0, n_pad - N), (0, n_pad - N)))
        text_p = jnp.pad(text, ((0, 0), (0, n_pad - N), (0, 0)))
    else:
        adj_p, text_p = adj, text

    w_p = jnp.pad(weight, ((0, 0), (0, f_pad - f_out)))
    if bias is None:
        b_p = jnp.zeros((1, f_pad), dtype=weight.dtype)
    else:
        b_p = jnp.pad(bias.reshape(1, f_out), ((0, 0), (0, f_pad - f_out)))

    n_i = n_pad // t_m
    n_k = n_pad // t_k

    adj_spec_kwargs = {}
    if adj_buffer_count != 2:
        # Deeper buffering of the dominant stream (useful on v7x's 3.2 TB/s).
        adj_spec_kwargs["pipeline_mode"] = pl.Buffered(adj_buffer_count)

    # On v7x, CORE_PARALLEL on the batch axis shards work across both
    # TensorCores; plain "parallel" is the portable default elsewhere.
    batch_sem = pltpu.CORE_PARALLEL if core_parallel_batch else "parallel"

    adj_bytes = adj_p.dtype.itemsize * B * n_pad * n_pad
    text_bytes = text_p.dtype.itemsize * B * n_i * n_pad * f_in
    out_bytes = jnp.dtype(out_dtype).itemsize * B * n_pad * f_pad
    cost = pl.CostEstimate(
        flops=2 * B * n_pad * n_pad * f_pad
        + 2 * B * n_i * n_pad * f_in * f_pad,
        transcendentals=0,
        bytes_accessed=adj_bytes + text_bytes + out_bytes,
    )

    out_p = pl.pallas_call(
        _make_gcn_kernel(f_out),
        out_shape=jax.ShapeDtypeStruct((B, n_pad, f_pad), out_dtype),
        grid_spec=pltpu.PrefetchScalarGridSpec(
            num_scalar_prefetch=0,
            grid=(B, n_i, n_k),
            in_specs=[
                pl.BlockSpec((pl.Squeezed(), t_m, t_k),
                             lambda b, i, k: (b, i, k), **adj_spec_kwargs),
                pl.BlockSpec((pl.Squeezed(), t_k, f_in),
                             lambda b, i, k: (b, k, 0)),
                pl.BlockSpec((f_in, f_pad), lambda b, i, k: (0, 0)),
                pl.BlockSpec((1, f_pad), lambda b, i, k: (0, 0)),
            ],
            out_specs=pl.BlockSpec((pl.Squeezed(), t_m, f_pad),
                                   lambda b, i, k: (b, i, 0)),
            scratch_shapes=[pltpu.VMEM((t_m, f_pad), jnp.float32)],
        ),
        compiler_params=pltpu.CompilerParams(
            dimension_semantics=(batch_sem, "parallel", "arbitrary")),
        cost_estimate=cost,
    )(adj_p, text_p, w_p, b_p)

    return out_p[:, :N, :f_out]


def graph_convolution_ref(text, adj, weight, bias):
    hidden = jnp.matmul(text, weight)
    denom = jnp.sum(adj, axis=2, keepdims=True) + 1.0
    out = jnp.matmul(adj, hidden) / denom
    return out + bias if bias is not None else out


if __name__ == "__main__":
    # Small shapes consistent with the module: batch=2, nodes=8,
    # in_features=16, out_features=32.
    B, N, F_IN, F_OUT = 2, 8, 16, 32

    key = jax.random.PRNGKey(0)
    k_text, k_adj, k_w, k_b = jax.random.split(key, 4)

    text = jax.random.normal(k_text, (B, N, F_IN), dtype=jnp.float32)
    adj = jax.random.uniform(k_adj, (B, N, N), dtype=jnp.float32)
    weight = jax.random.normal(k_w, (F_IN, F_OUT), dtype=jnp.float32) * 0.1
    bias = jax.random.normal(k_b, (F_OUT,), dtype=jnp.float32) * 0.1

    ref = graph_convolution_ref(text, adj, weight, bias)

    # f32 path: exact division, no approx reciprocal -> tight tolerance.
    out = jax.block_until_ready(graph_convolution(text, adj, weight, bias))
    assert out.shape == (B, N, F_OUT)
    assert jnp.allclose(out, ref, atol=5e-3, rtol=5e-3), float(
        jnp.max(jnp.abs(out - ref)))

    # bf16-stream path: halves the dominant adj HBM stream, f32 accumulation.
    out_bf16 = jax.block_until_ready(graph_convolution(
        text.astype(jnp.bfloat16), adj.astype(jnp.bfloat16),
        weight.astype(jnp.bfloat16), bias.astype(jnp.bfloat16)))
    assert jnp.allclose(out_bf16.astype(jnp.float32), ref,
                        atol=5e-2, rtol=5e-2)

    # bias=None path.
    out_nb = jax.block_until_ready(graph_convolution(text, adj, weight, None))
    ref_nb = graph_convolution_ref(text, adj, weight, None)
    assert jnp.allclose(out_nb, ref_nb, atol=5e-3, rtol=5e-3)

    print("KERNEL_OK")
</pallas_src>

<mosaic_0001>
module attributes {stable_mosaic.version = 11 : i64} {
  func.func @kernel(%arg0: i32, %arg1: i32, %arg2: i32, %arg3: memref<1x8x8xf32, #tpu.memory_space<vmem>>, %arg4: memref<1x8x16xf32, #tpu.memory_space<vmem>>, %arg5: memref<16x128xf32, #tpu.memory_space<vmem>>, %arg6: memref<1x128xf32, #tpu.memory_space<vmem>>, %arg7: memref<1x8x128xf32, #tpu.memory_space<vmem>>, %arg8: memref<8x128xf32, #tpu.memory_space<vmem>>) attributes {dimension_semantics = [#tpu.dimension_semantics<parallel>, #tpu.dimension_semantics<parallel>, #tpu.dimension_semantics<arbitrary>], iteration_bounds = array<i64: 2, 1, 1>, scalar_prefetch = 0 : i64, scratch_operands = 1 : i64, tpu.core_type = #tpu.core_type<tc>, window_params = [{transform_indices = @transform_0, window_bounds = array<i64: 1, 8, 8>}, {transform_indices = @transform_1, window_bounds = array<i64: 1, 8, 16>}, {pipeline_mode = #tpu.pipeline_mode<synchronous>, transform_indices = @transform_2, window_bounds = array<i64: 16, 128>}, {pipeline_mode = #tpu.pipeline_mode<synchronous>, transform_indices = @transform_3, window_bounds = array<i64: 1, 128>}, {transform_indices = @transform_4, window_bounds = array<i64: 1, 8, 128>}]} {
    %c0_i32 = arith.constant 0 : i32
    %0 = arith.cmpi eq, %arg2, %c0_i32 : i32
    %1 = arith.extui %0 : i1 to i32
    %c0_i32_0 = arith.constant 0 : i32
    %2 = arith.cmpi ne, %1, %c0_i32_0 : i32
    scf.if %2 {
      %cst_16 = arith.constant 0.000000e+00 : f32
      %21 = vector.broadcast %cst_16 : f32 to vector<8x128xf32>
      %c0_17 = arith.constant 0 : index
      %c0_18 = arith.constant 0 : index
      %22 = vector.load %arg8[%c0_17, %c0_18] : memref<8x128xf32, #tpu.memory_space<vmem>>, vector<8x128xf32>
      tpu.vector_store %arg8[%c0_17, %c0_18], %21 {strides = array<i32>} : memref<8x128xf32, #tpu.memory_space<vmem>>, vector<8x128xf32>,
    } else {
    }
    %c0 = arith.constant 0 : index
    %c0_1 = arith.constant 0 : index
    %c0_2 = arith.constant 0 : index
    %3 = vector.load %arg4[%c0, %c0_1, %c0_2] : memref<1x8x16xf32, #tpu.memory_space<vmem>>, vector<1x8x16xf32>
    %4 = vector.shape_cast %3 : vector<1x8x16xf32> to vector<8x16xf32>
    %c0_3 = arith.constant 0 : index
    %c0_4 = arith.constant 0 : index
    %5 = vector.load %arg5[%c0_3, %c0_4] : memref<16x128xf32, #tpu.memory_space<vmem>>, vector<16x128xf32>
    %cst = arith.constant dense<0.000000e+00> : vector<8x128xf32>
    %6 = tpu.matmul %4, %5, %cst {dimension_numbers = #tpu.dot_dimension_numbers<[1], [0], [0], [1], [0, 0, 1, 1], [], []>} : vector<8x16xf32>, vector<16x128xf32>, vector<8x128xf32> -> vector<8x128xf32>
    %7 = tpu.iota {dimensions = array<i32: 1>} : vector<8x128xi32>
    %c32_i32 = arith.constant 32 : i32
    %8 = vector.broadcast %c32_i32 : i32 to vector<8x128xi32>
    %9 = arith.cmpi eq, %7, %8 : vector<8x128xi32>
    %cst_5 = arith.constant 1.000000e+00 : f32
    %10 = vector.broadcast %cst_5 : f32 to vector<8x128xf32>
    %11 = arith.select %9, %10, %6 : vector<8x128xi1>, vector<8x128xf32>
    %c0_6 = arith.constant 0 : index
    %c0_7 = arith.constant 0 : index
    %12 = vector.load %arg8[%c0_6, %c0_7] : memref<8x128xf32, #tpu.memory_space<vmem>>, vector<8x128xf32>
    %c0_8 = arith.constant 0 : index
    %c0_9 = arith.constant 0 : index
    %c0_10 = arith.constant 0 : index
    %13 = vector.load %arg3[%c0_8, %c0_9, %c0_10] : memref<1x8x8xf32, #tpu.memory_space<vmem>>, vector<1x8x8xf32>
    %14 = vector.shape_cast %13 : vector<1x8x8xf32> to vector<8x8xf32>
    %cst_11 = arith.constant dense<0.000000e+00> : vector<8x128xf32>
    %15 = tpu.matmul %14, %11, %cst_11 {dimension_numbers = #tpu.dot_dimension_numbers<[1], [0], [0], [1], [0, 0, 1, 1], [], []>} : vector<8x8xf32>, vector<8x128xf32>, vector<8x128xf32> -> vector<8x128xf32>
    %16 = arith.addf %12, %15 : vector<8x128xf32>
    %c0_12 = arith.constant 0 : index
    %c0_13 = arith.constant 0 : index
    %17 = vector.load %arg8[%c0_12, %c0_13] : memref<8x128xf32, #tpu.memory_space<vmem>>, vector<8x128xf32>
    tpu.vector_store %arg8[%c0_12, %c0_13], %16 {strides = array<i32>} : memref<8x128xf32, #tpu.memory_space<vmem>>, vector<8x128xf32>,
    %c0_i32_14 = arith.constant 0 : i32
    %18 = arith.cmpi eq, %arg2, %c0_i32_14 : i32
    %19 = arith.extui %18 : i1 to i32
    %c0_i32_15 = arith.constant 0 : i32
    %20 = arith.cmpi ne, %19, %c0_i32_15 : i32
    scf.if %20 {
      %c0_16 = arith.constant 0 : index
      %c0_17 = arith.constant 0 : index
      %21 = vector.load %arg8[%c0_16, %c0_17] : memref<8x128xf32, #tpu.memory_space<vmem>>, vector<8x128xf32>
      %22 = tpu.iota {dimensions = array<i32: 1>} : vector<8x128xi32>
      %c32_i32_18 = arith.constant 32 : i32
      %23 = vector.broadcast %c32_i32_18 : i32 to vector<8x128xi32>
      %24 = arith.cmpi eq, %22, %23 : vector<8x128xi32>
      %cst_19 = arith.constant 0.000000e+00 : f32
      %25 = vector.broadcast %cst_19 : f32 to vector<8x128xf32>
      %26 = arith.select %24, %21, %25 : vector<8x128xi1>, vector<8x128xf32>
      %cst_20 = arith.constant dense<0.000000e+00> : vector<8xf32>
      %27 = vector.multi_reduction <add>, %26, %cst_20 [1] : vector<8x128xf32> to vector<8xf32>
      %28 = vector.shape_cast %27 : vector<8xf32> to vector<8x1xf32>
      %cst_21 = arith.constant 1.000000e+00 : f32
      %29 = vector.broadcast %cst_21 : f32 to vector<8x1xf32>
      %30 = arith.addf %28, %29 : vector<8x1xf32>
      %31 = vector.broadcast %30 : vector<8x1xf32> to vector<8x128xf32>
      %32 = arith.divf %21, %31 : vector<8x128xf32>
      %c0_22 = arith.constant 0 : index
      %c0_23 = arith.constant 0 : index
      %33 = vector.load %arg6[%c0_22, %c0_23] : memref<1x128xf32, #tpu.memory_space<vmem>>, vector<1x128xf32>
      %34 = vector.broadcast %33 : vector<1x128xf32> to vector<8x128xf32>
      %35 = arith.addf %32, %34 : vector<8x128xf32>
      %c0_24 = arith.constant 0 : index
      %c0_25 = arith.constant 0 : index
      %c0_26 = arith.constant 0 : index
      %36 = vector.load %arg7[%c0_24, %c0_25, %c0_26] : memref<1x8x128xf32, #tpu.memory_space<vmem>>, vector<1x8x128xf32>
      %37 = vector.shape_cast %36 : vector<1x8x128xf32> to vector<8x128xf32>
      %38 = vector.shape_cast %35 : vector<8x128xf32> to vector<1x8x128xf32>
      tpu.vector_store %arg7[%c0_24, %c0_25, %c0_26], %38 {strides = array<i32>} : memref<1x8x128xf32, #tpu.memory_space<vmem>>, vector<1x8x128xf32>,
    } else {
    }
    return
  }
  func.func @transform_0(%arg0: i32, %arg1: i32, %arg2: i32) -> (i32, i32, i32) {
    %c0_i32 = arith.constant 0 : i32
    return %arg0, %arg1, %arg2 : i32, i32, i32
  }
  func.func @transform_1(%arg0: i32, %arg1: i32, %arg2: i32) -> (i32, i32, i32) {
    %c0_i32 = arith.constant 0 : i32
    %c0_i32_0 = arith.constant 0 : i32
    return %arg0, %arg2, %c0_i32 : i32, i32, i32
  }
  func.func @transform_2(%arg0: i32, %arg1: i32, %arg2: i32) -> (i32, i32) {
    %c0_i32 = arith.constant 0 : i32
    %c0_i32_0 = arith.constant 0 : i32
    %c0_i32_1 = arith.constant 0 : i32
    return %c0_i32, %c0_i32_0 : i32, i32
  }
  func.func @transform_3(%arg0: i32, %arg1: i32, %arg2: i32) -> (i32, i32) {
    %c0_i32 = arith.constant 0 : i32
    %c0_i32_0 = arith.constant 0 : i32
    %c0_i32_1 = arith.constant 0 : i32
    return %c0_i32, %c0_i32_0 : i32, i32
  }
  func.func @transform_4(%arg0: i32, %arg1: i32, %arg2: i32) -> (i32, i32, i32) {
    %c0_i32 = arith.constant 0 : i32
    %c0_i32_0 = arith.constant 0 : i32
    return %arg0, %arg1, %c0_i32 : i32, i32, i32
  }
}

</mosaic_0001>

<bundles_post_ra>
// kernel: tpu_custom_call.1
= control target key start
LH: loop header
LB: loop body
LE: loop exit
PB: predicated region body
PF: predicated region fallthrough
CT: control target
= control target key end

     0   :  { %s1000_s0 = inlined_call_operand.hbm [shape: f32[2,8,8], index: 0, kind: input, shape index: {}]   ;;  %s1001_s1 = inlined_call_operand.hbm [shape: f32[2,8,16], index: 1, kind: input, shape index: {}]   ;;  %s1002_s2 = inlined_call_operand.hbm [shape: f32[16,128], index: 2, kind: input, shape index: {}]   ;;  %s1003_s3 = inlined_call_operand.vmem [shape: f32[1,128], index: 3, kind: input, shape index: {}]   ;;  %s1004_s4 = inlined_call_operand.hbm [shape: f32[2,8,128], index: 4, kind: output, shape index: {}]  }
   0x1   :  { %1008 = sst [smem:[#allocation18_spill]] %s1002_s2 }
   0x2   :  { %9 = vsyncpa [#allocation4], 0 }
   0x3   :  { %11 = vsyncpa [#allocation4 + $0x1], 0 }
   0x4   :  { %12 = vsyncpa [#allocation7], 0 }
   0x5   :  { %14 = vsyncpa [#allocation7 + $0x1], 0 }
   0x6   :  { %15 = vsyncpa [#allocation5], 0 }
   0x7   :  { %17 = vsyncpa [#allocation5 + $0x1], 0  ;;  %s840_s15 = smov 0   ;;  %s842_s16 = smov 0  }
   0x8   :  { %s844_s17 = smov 0   ;;  %s846_s18 = smov 0  }
   0x9   :  { %s848_s19 = smov 0   ;;  %s850_s20 = smov 0  }
   0xa LB: > { %1009 = sst [smem:[#allocation14_spill]] %s798_s17  ;;  %s871_s21 = sadd.s32 4294967295, %s810_s20   ;;  %s810_s20 = sphi %s850_s20, %s23_s20   ;;  %s806_s19 = sphi %s848_s19, %s1022_s19   ;;  %s802_s18 = sphi %s846_s18, %s1021_s18   ;;  %s798_s17 = sphi %s844_s17, %s1020_s17   ;;  %s794_s16 = sphi %s842_s16, %s1024_s16   ;;  %s790_s15 = sphi %s840_s15, %s1023_s15  }
   0xb   : > { %1010 = sst [smem:[#allocation15_spill]] %s806_s19  ;;  %p529_p0 = scmp.ge.s32.totalorder %s810_s20, 1 }
   0xc   : > { %p67_p1 = scmp.eq.s32.totalorder %s871_s21, 0  ;;  %p175_p2 = scmp.lt.s32.totalorder %s810_s20, 3 }
   0xd   : > { %s1011_s2 = sld [smem:[#allocation18_spill]]  ;;  %s812_s26 = smov [#allocation8]  }
   0xe   : > { %p879_p3 = pnand %p529_p0, %p175_p2  ;;  %s188_s27 = sshll.u32 %s812_s26, 4  ;;  %s189_s27 = int_to_ptr.vmem [resolvable:$true] %s188_s27 }
   0xf   : > { %p531_p6 = scmp.ge.s32.totalorder %s810_s20, 2  ;;  %s813_s28 = smov 128  }
  0x10   : > { %p557_p4 = pneg %p879_p3  ;;  %s814_s29 = smov 8  }
  0x11   : > { %s528_s30 = sadd.s32 4294967294, %s810_s20   ;;  %s42_s5 = sadd.s32 1, %s806_s19 }
  0x12   : > { %p558_p5 = pnand %p557_p4, %p67_p1  ;;  %s53_s6 = sadd.s32 1, %s798_s17 }
  0x13   : > { %s186_s24 = sshll.u32 %s1011_s2, 4  ;;  %p44_p7 = scmp.ge.s32.totalorder %s42_s5, 2  ;;  %s187_s24 = int_to_ptr.hbm [resolvable:$true] %s186_s24 }
  0x14   : > { %560 = dma.hbm_to_vmem [thread:$0]  (!%p558_p5), %s187_s24, 256, %s189_s27, [#allocation7], %s813_s28, %s813_s28, %s814_s29  }
  0x15   : > { %p60_p8 = scmp.ne.s32.totalorder %s798_s17, %s794_s16  ;;  %p61_p9 = scmp.eq.s32.totalorder %s810_s20, 0 }
  0x16   : > { %p66_p10 = scmp.ne.s32.totalorder %s794_s16, %s790_s15  ;;  %s1026_s5 = smov (%p44_p7, %s42_s5), 0 }
  0x17   : > { %1013 = sst [smem:[#allocation16_spill]] %s1026_s5  ;;  %p898_p11 = por %p61_p9, %p60_p8 }
  0x18   : > { %p904_p12 = por %p67_p1, %p66_p10  ;;  %s46_s9 = ssub.s32 %s806_s19, %s1026_s5 }
  0x19   : > { %p162_p13 = scmp.eq.s32.totalorder %s871_s21, 1  ;;  %p51_p0 = scmp.eq.s32.totalorder %s46_s9, 0 }
  0x1a   : > { %p168_p2 = scmp.eq.s32.totalorder %s528_s30, 1  ;;  %p573_p5 = scmp.lt.s32.totalorder %s810_s20, 2 }
  0x1b   : > { %p911_p4 = por %p162_p13, %p60_p8  ;;  %s205_s13 = sand.u32 1, %s798_s17  }
  0x1c   : > { %s917_s11 = scalar_select %p51_p0, %s798_s17, %s53_s6  }
  0x1d   : > { %p919_p7 = por %p168_p2, %p66_p10  ;;  %s532_s14 = sshll.u32 %s205_s13, 3 }
  0x1e   : > { %1017 = sst [smem:[#allocation17_spill]] %s917_s11  ;;  %s533_s22 = sshll.u32 %s806_s19, 3 }
  0x1f   : > { %s215_s26 = scalar_lea.hbm %s1000_s0, %s533_s22  ;;  %s209_s27 = scalar_lea.vmem [#allocation3], %s532_s14 }
  0x20   : > { %s219_s28 = sshll.u32 %s209_s27, 4  ;;  %s217_s29 = sshll.u32 %s215_s26, 4  ;;  %s220_s28 = int_to_ptr.vmem [resolvable:$true] %s219_s28  ;;  %s218_s29 = int_to_ptr.hbm [resolvable:$true] %s217_s29 }
  0x21   : > { %p562_p8 = pnand %p573_p5, %p898_p11  ;;  %s235_s9 = scalar_lea.hbm %s1001_s1, %s533_s22 }
  0x22   : > { %s226_s2 = sand.u32 1, %s810_s20   ;;  %s206_s5 = scalar_lea.sflag [#allocation4], %s205_s13 }
  0x23   : > { %564 = dma.hbm_to_vmem [thread:$0]  (!%p562_p8), %s218_s29, 128, %s220_s28, %s206_s5  }
  0x24   : > { %s237_s11 = sshll.u32 %s235_s9, 4  ;;  %s230_s19 = scalar_lea.vmem [#allocation6], %s532_s14  ;;  %s238_s11 = int_to_ptr.hbm [resolvable:$true] %s237_s11 }
  0x25   : > { %s239_s17 = sshll.u32 %s230_s19, 4  ;;  %s227_s23 = scalar_lea.sflag [#allocation7], %s226_s2  ;;  %s240_s17 = int_to_ptr.vmem [resolvable:$true] %s239_s17 }
  0x26   : > { %567 = dma.hbm_to_vmem [thread:$0]  (!%p562_p8), %s238_s11, 128, %s240_s17, %s227_s23  }
  0x27   : > { %248 = sbr.rel (%p879_p3) target bundleno = 451 (0x1c3), region = 36  ;;  %s937_s7 = sand.u32 (!%p879_p3), 1, %s794_s16  }
  0x28   : > { %s940_s22 = sshll.u32 (!%p879_p3), %s937_s7, 3  ;;  %s251_s5 = scalar_lea.sflag (!%p879_p3), [#allocation4], %s937_s7 }
  0x29   : > { %s254_s13 = scalar_lea.vmem (!%p879_p3), [#allocation3], %s940_s22 }
  0x2c   : > { %773 = dma.done.wait (%p904_p12), %s251_s5, 128  }
  0x2d   : > { %775 = vsyncadd (%p904_p12), %s251_s5, 4294967168  ;;  %s260_s2 = sand.u32 1, %s871_s21   ;;  %s264_s19 = scalar_lea.vmem [#allocation6], %s940_s22 }
  0x2e   : > { %s261_s17 = scalar_lea.sflag [#allocation7], %s260_s2 }
  0x2f   : > { %777 = dma.done.wait (%p904_p12), %s261_s17, 128  }
  0x30   : > { %779 = vsyncadd (%p904_p12), %s261_s17, 4294967168 }
  0x31   : > { %781 = dma.done.wait (%p67_p1), [#allocation7], 256  }
  0x32   : > { %783 = vsyncadd (%p67_p1), [#allocation7], 4294967040  ;;  %v307_v0 = vld [vmem:[#allocation8 + $0x8] sm:$0xff]  ;;  %v306_v1 = vld [vmem:[#allocation8] sm:$0xff]  ;;  %vm308_vm0 = vcmask 130048   ;;  %v332_v3 = vlaneseq  ;;  %vm338_vm2 = vcmask 64512  }
  0x33   : > { %326 = vmatpush.msra.mxu0 %v307_v0  ;;  %v305_v2 = vld [vmem:[%s264_s19] sm:$0xff]  ;;  %v337_v6 = vld [vmem:[%s254_s13] sm:$0xff]  ;;  %s544_s21 = sshll.u32 %s802_s18, 3  ;;  %s299_s18 = scalar_lea.vmem [#allocation9], %s940_s22 }
  0x34   : > { %v333_v4 = vand.u32 127, %v332_v3  ;;  %s405_s11 = scalar_lea.hbm %s1004_s4, %s544_s21  ;;  %v627_v21 = vld [vmem:[%s1003_s3] ss:$0 sm:$0xff]  ;;  %s407_s26 = sshll.u32 %s299_s18, 4  ;;  %s408_s26 = int_to_ptr.vmem [resolvable:$true] %s407_s26 }
  0x35   : > { %327 = vmatpush.msra.mxu0 %v306_v1  ;;  %s409_s27 = sshll.u32 %s405_s11, 4  ;;  %s394_s28 = scalar_lea.sflag [#allocation5], %s937_s7  ;;  %s410_s27 = int_to_ptr.hbm [resolvable:$true] %s409_s27 }
  0x36   : > { %541 = vmatmul.msk.f32.vlgmr.msra.gmra.mxu0 %vm308_vm0, %v305_v2  ;;  %vm334_vm1 = vcmp.eq.s32.totalorder %v333_v4, 32  ;;  %s734_s29 = sshra.s32 %s410_s27, 4  ;;  %s740_s23 = scalar_lea.hbm %s1004_s4, 16  ;;  %s735_s29 = int_to_ptr.hbm [resolvable:$true] %s734_s29 }
  0x37   : > { %s736_s30 = scalar_lea.hbm %s735_s29, 8  ;;  %p741_p10 = scmp.lt.s32.totalorder %s735_s29, %s1004_s4 }
  0x38   : > { %p737_p1 = scmp.ne.s32.totalorder %s735_s29, %s736_s30  ;;  %p742_p11 = scmp.lt.s32.totalorder %s740_s23, %s736_s30 }
  0x3a   : > { %p738_p3 = pnand %p737_p1, %p911_p4  ;;  %p743_p12 = por %p742_p11, %p741_p10 }
  0x3c   : > { %p739_p9 = pneg %p738_p3 }
  0x3e   : > { %p744_p13 = pnand %p743_p12, %p739_p9 }
  0xb3   : > { %v329_v5 = vpop.f32.mrf.mxu0 }
  0xb4   : > { %v335_v7 = vsel %vm334_vm1, 1.0, %v329_v5 }
  0xb5   : > { %357 = vmatpush.msra.mxu1 %v335_v7 }
  0xb6   : > { %542 = vmatmul.msk.f32.vlgmr.msra.gmra.mxu1 %vm338_vm2, %v337_v6 }
 0x133   : > { %v359_v8 = vpop.f32.mrf.mxu1 }
 0x134   : > { %v368_v9 = vsel %vm334_vm1, %v359_v8, 0.0 }
 0x135   : > { %369 = vadd.xlane.f32.xlu0 %v368_v9 }
 0x1a8   : > { %v370_v10 = vpop.xlane.xlu0 %369 }
 0x1a9   : > { %v371_v11 = vadd.f32 1.0, %v370_v10 }
 0x1ab   : > { %628 = vrcp.f32 %v371_v11  ;;  %v383_v15 = vand.u32 2147483648, %v371_v11  ;;  %v381_v17 = vand.u32 2147483647, %v371_v11  ;;  %vm377_vm4 = vweird.f32 %v371_v11 }
 0x1ad   : > { %v384_v19 = vor.u32 1.1754944e-38, %v383_v15  ;;  %vm382_vm6 = vcmp.eq.f32.partialorder %v381_v17, 8.507059e+37 }
 0x1b1   : > { %v629_v12 = vpop.eup %628 }
 0x1b2   : > { %v373_v13 = vmul.f32 %v629_v12, %v371_v11  ;;  %vm378_vm3 = vweird.f32 %v629_v12 }
 0x1b3   : > { %vm379_vm5 = vmor %vm377_vm4, %vm378_vm3 }
 0x1b4   : > { %v374_v14 = vsub.f32 1.0, %v373_v13 }
 0x1b6   : > { %v375_v16 = vmul.f32 %v629_v12, %v374_v14 }
 0x1b8   : > { %v376_v18 = vadd.f32 %v629_v12, %v375_v16 }
 0x1ba   : > { %v380_v20 = vsel %vm379_vm5, %v629_v12, %v376_v18 }
 0x1bb   : > { %v385_v22 = vsel %vm382_vm6, %v384_v19, %v380_v20 }
 0x1bc   : > { %v386_v23 = vmul.f32 %v385_v22, %v359_v8 }
 0x1be   : > { %v391_v24 = vadd.f32 %v627_v21, %v386_v23 }
 0x1c0   : > { %392 = vst [vmem:[%s299_s18] sm:$0xff] %v391_v24 }
 0x1c1   : > { %747 = shalt.err (!%p744_p13)
}
 0x1c2   : > { %555 = dma.vmem_to_hbm [thread:$0]  (%p911_p4), %s408_s26, 128, %s410_s27, %s394_s28  }
 0x1c3 PF: > { %s421_s7 = sand.u32 1, %s790_s15   ;;  %p569_p0 = pnand %p531_p6, %p919_p7 }
 0x1c4   : > { %s422_s13 = scalar_lea.sflag [#allocation5], %s421_s7 }
 0x1c5   : > { %p570_p2 = pneg %p569_p0 }
 0x1c7   : > { %785 = dma.done.wait (%p570_p2), %s422_s13, 128  }
 0x1c8   : > { %787 = vsyncadd (%p570_p2), %s422_s13, 4294967168  ;;  %s23_s20 = sadd.s32 1, %s810_s20   ;;  %s1019_s2 = sld [smem:[#allocation14_spill]] }
 0x1c9   : > { %p20_p5 = scmp.ge.s32.totalorder %s23_s20, 4   ;;  %s1020_s17 = sld [smem:[#allocation17_spill]] }
 0x1ca   : > { %s1021_s18 = sld [smem:[#allocation15_spill]]  ;;  %s1023_s15 = smov %s794_s16 }
 0x1cb   : > { %s1022_s19 = sld [smem:[#allocation16_spill]]  ;;  %22 = sbr.rel (!%p20_p5) target bundleno = 10 (0xa), region = 106 }
 0x1ce   : > { %s1024_s16 = smov %s1019_s2 }
 0x1d0   :  { %428 = vsyncpa [#allocation4], 1 }
 0x1d1   :  { %430 = vsyncpa [#allocation4 + $0x1], 1 }
 0x1d2   :  { %431 = vsyncpa [#allocation7], 1 }
 0x1d3   :  { %433 = vsyncpa [#allocation7 + $0x1], 1 }
 0x1d4   :  { %434 = vsyncpa [#allocation5], 1 }
 0x1d5   :  { %436 = vsyncpa [#allocation5 + $0x1], 1 }

</bundles_post_ra>
